<compile_context>
chip_gen: v7x
topology: tpu7x:2x2x1
jax: 0.10.0
libtpu: 0.0.40
codegen_flags: <defaults>
</compile_context>

<pallas_src>
import jax
import jax.numpy as jnp
from jax.experimental import pallas as pl
from jax.experimental.pallas import tpu as pltpu


# ----------------------------------------------------------------------------- kernels

def _ffn_kernel_resident(x_ref, w1_ref, b1_ref, w2_ref, b2_ref, o_ref):
    """Weights-resident path: one (bm, D) row tile, full W1/W2 in VMEM.

    x_ref: (bm, D)  w1_ref: (D, H)  b1_ref: (1, H)  w2_ref: (H, D)  b2_ref: (1, D)
    """
    h = jnp.dot(x_ref[...], w1_ref[...], preferred_element_type=jnp.float32)
    h = jnp.maximum(h + b1_ref[...], 0.0)
    out = jnp.dot(h.astype(w2_ref.dtype), w2_ref[...],
                  preferred_element_type=jnp.float32)
    o_ref[...] = (out + b2_ref[...]).astype(o_ref.dtype)


def _ffn_kernel_tiled(x_ref, w1_ref, b1_ref, w2_ref, b2_ref, o_ref, acc_ref):
    """H-tiled path: one (bm, D) row tile x one bh-wide slice of the hidden dim.

    x_ref: (bm, D)   w1_ref: (D, bh)   b1_ref: (1, bh)
    w2_ref: (bh, D)  b2_ref: (1, D)    o_ref:  (bm, D)   acc_ref: (bm, D) f32
    """
    h_idx = pl.program_id(1)

    @pl.when(h_idx == 0)
    def _():
        # Fold b2 into the accumulator init (saves a (bm, D) add in the epilogue).
        acc_ref[...] = jnp.broadcast_to(b2_ref[...], acc_ref.shape)

    # First linear (this hidden slice) + ReLU; f32 accumulation on the MXU.
    h = jnp.dot(x_ref[...], w1_ref[...], preferred_element_type=jnp.float32)
    h = jnp.maximum(h + b1_ref[...], 0.0)

    # Second linear: partial contribution of this hidden slice, accumulated in f32.
    acc_ref[...] += jnp.dot(h.astype(w2_ref.dtype), w2_ref[...],
                            preferred_element_type=jnp.float32)

    @pl.when(h_idx == pl.num_programs(1) - 1)
    def _():
        o_ref[...] = acc_ref[...].astype(o_ref.dtype)


# ----------------------------------------------------------------------------- helpers

def _round_up(v, m):
    return ((v + m - 1) // m) * m


def _tpu_info():
    """Best-effort (generation string, VMEM capacity bytes). Conservative on failure."""
    name, vmem = "", 64 << 20
    try:
        info = pltpu.get_tpu_info()
        vmem = int(getattr(info, "vmem_capacity_bytes", vmem))
        name = str(getattr(info, "chip_version", "")).lower()
    except Exception:
        pass
    return name, vmem


# ----------------------------------------------------------------------------- wrapper

def feed_forward(x, w1, b1, w2, b2, *, compute_dtype=jnp.bfloat16, block_m=None):
    """x: (..., D) -> (..., D).  w1: (D, H), b1: (H,), w2: (H, D), b2: (D,)."""
    orig_shape = x.shape
    out_dtype = x.dtype
    D = orig_shape[-1]
    H = w1.shape[1]

    x2d = x.reshape(-1, D)
    M = x2d.shape[0]

    gen, vmem_cap = _tpu_info()
    vmem_budget = max(vmem_cap - (8 << 20), 16 << 20)   # headroom for Mosaic scratch

    cbytes = jnp.dtype(compute_dtype).itemsize
    obytes = jnp.dtype(out_dtype).itemsize
    bias_bytes = 2 * 4 * (H + D + 256)                  # f32 biases, double-buffered

    # ---- row tile: per-generation target (roofline knee), clamped to M -------
    if block_m is None:
        if "v5" in gen:
            bm_target = 256            # v5e already compute-bound at 256
        elif vmem_cap <= (80 << 20):
            bm_target = 512            # v7x-class: 64 MiB VMEM, knee ~310 FLOP/B
        else:
            bm_target = 1024           # v6e-class: 128 MiB VMEM, knee ~650 FLOP/B
    else:
        bm_target = block_m
    bm = min(bm_target, max(8, _round_up(M, 8)))

    def xo_bytes(bm_):
        # double-buffered x input tiles + output tiles
        return 2 * bm_ * D * cbytes + 2 * bm_ * D * obytes

    # ---- dtype handling: bf16 matmuls, f32 accumulation and biases ----------
    x2d = x2d.astype(compute_dtype)
    w1c = w1.astype(compute_dtype)
    w2c = w2.astype(compute_dtype)

    # ---- path selection -------------------------------------------------------
    resident_bytes = xo_bytes(bm) + 4 * D * H * cbytes + bias_bytes
    use_resident = resident_bytes <= vmem_budget

    num_row_blocks = pl.cdiv(M, bm)
    flops = 4 * M * D * H                       # two matmuls: 2*M*D*H each
    # TODO(synk): for M <= bm on 2-TC chips (v7x) the single row block uses only one
    # TensorCore; a hidden-split-across-cores variant would roughly double decode BW.

    if use_resident:
        b1_2d = b1.reshape(1, H).astype(jnp.float32)
        b2_2d = b2.reshape(1, D).astype(jnp.float32)

        vmem_est = resident_bytes
        bytes_accessed = (M * D * cbytes + 2 * D * H * cbytes      # weights once
                          + M * D * obytes + (H + D) * 4)
        vmem_limit = min(max(32 << 20, int(1.25 * vmem_est) + (4 << 20)),
                         vmem_cap - (2 << 20))

        out = pl.pallas_call(
            _ffn_kernel_resident,
            out_shape=jax.ShapeDtypeStruct((M, D), out_dtype),
            grid_spec=pltpu.PrefetchScalarGridSpec(
                num_scalar_prefetch=0,
                grid=(num_row_blocks,),
                in_specs=[
                    pl.BlockSpec((bm, D), lambda i: (i, 0)),   # x row tile
                    pl.BlockSpec((D, H), lambda i: (0, 0)),    # W1 (resident)
                    pl.BlockSpec((1, H), lambda i: (0, 0)),    # b1
                    pl.BlockSpec((H, D), lambda i: (0, 0)),    # W2 (resident)
                    pl.BlockSpec((1, D), lambda i: (0, 0)),    # b2
                ],
                out_specs=pl.BlockSpec((bm, D), lambda i: (i, 0)),
            ),
            compiler_params=pltpu.CompilerParams(
                dimension_semantics=("parallel",),
                vmem_limit_bytes=vmem_limit),
            cost_estimate=pl.CostEstimate(flops=flops, transcendentals=0,
                                          bytes_accessed=bytes_accessed),
        )(x2d, w1c, b1_2d, w2c, b2_2d)
    else:
        # ---- H-tiled fallback: pad H to a lane-dense multiple of 128 (zeros are a
        # mathematical no-op: ReLU(0 + 0) @ 0 == 0), then pick the largest bh that
        # divides Hp and fits the VMEM budget together with the row tile. ----------
        Hp = _round_up(H, 128)
        if Hp != H:
            w1c = jnp.pad(w1c, ((0, 0), (0, Hp - H)))
            w2c = jnp.pad(w2c, ((0, Hp - H), (0, 0)))
            b1p = jnp.pad(b1.astype(jnp.float32), (0, Hp - H))
        else:
            b1p = b1.astype(jnp.float32)
        b1_2d = b1p.reshape(1, Hp)
        b2_2d = b2.reshape(1, D).astype(jnp.float32)

        def tiled_bytes(bm_, bh_):
            return (xo_bytes(bm_) + 4 * D * bh_ * cbytes   # W1 + W2 tiles, 2-buffered
                    + bm_ * D * 4 + bias_bytes)            # f32 accumulator

        candidates = [c for c in (1024, 512, 256, 128) if Hp % c == 0] or [Hp]
        bh = candidates[-1]
        for cand in candidates:
            if tiled_bytes(bm, cand) <= vmem_budget:
                bh = cand
                break
        # If even the smallest hidden tile doesn't fit, shrink the row tile.
        while bm > 8 and tiled_bytes(bm, bh) > vmem_budget:
            bm = max(8, _round_up(bm // 2, 8))
        num_row_blocks = pl.cdiv(M, bm)

        vmem_est = tiled_bytes(bm, bh)
        bytes_accessed = (M * D * cbytes
                          + num_row_blocks * 2 * D * Hp * cbytes   # weights per row tile
                          + M * D * obytes + (Hp + D) * 4)
        vmem_limit = min(max(32 << 20, int(1.25 * vmem_est) + (4 << 20)),
                         vmem_cap - (2 << 20))

        out = pl.pallas_call(
            _ffn_kernel_tiled,
            out_shape=jax.ShapeDtypeStruct((M, D), out_dtype),
            grid_spec=pltpu.PrefetchScalarGridSpec(
                num_scalar_prefetch=0,
                grid=(num_row_blocks, Hp // bh),
                in_specs=[
                    pl.BlockSpec((bm, D), lambda i, h: (i, 0)),   # x row tile
                    pl.BlockSpec((D, bh), lambda i, h: (0, h)),   # W1 hidden slice
                    pl.BlockSpec((1, bh), lambda i, h: (0, h)),   # b1 hidden slice
                    pl.BlockSpec((bh, D), lambda i, h: (h, 0)),   # W2 hidden slice
                    pl.BlockSpec((1, D), lambda i, h: (0, 0)),    # b2
                ],
                out_specs=pl.BlockSpec((bm, D), lambda i, h: (i, 0)),
                scratch_shapes=[pltpu.VMEM((bm, D), jnp.float32)],
            ),
            compiler_params=pltpu.CompilerParams(
                dimension_semantics=("parallel", "arbitrary"),
                vmem_limit_bytes=vmem_limit),
            cost_estimate=pl.CostEstimate(flops=flops, transcendentals=0,
                                          bytes_accessed=bytes_accessed),
        )(x2d, w1c, b1_2d, w2c, b2_2d)

    return out.reshape(orig_shape)


# TODO(synk): Dropout(p=0.0) is the identity and is omitted; p > 0 (training) would need
# in-kernel pltpu.prng_seed/prng_random_bits masking.


def init_feed_forward_params(key, embed_dim, dtype=jnp.float32):
    """Deterministic init matching nn.Linear's default (uniform +-1/sqrt(fan_in))."""
    hidden = 4 * embed_dim
    k1, k2, k3, k4 = jax.random.split(key, 4)
    bound1 = 1.0 / (embed_dim ** 0.5)
    bound2 = 1.0 / (hidden ** 0.5)
    w1 = jax.random.uniform(k1, (embed_dim, hidden), dtype, -bound1, bound1)
    b1 = jax.random.uniform(k2, (hidden,), dtype, -bound1, bound1)
    w2 = jax.random.uniform(k3, (hidden, embed_dim), dtype, -bound2, bound2)
    b2 = jax.random.uniform(k4, (embed_dim,), dtype, -bound2, bound2)
    return w1, b1, w2, b2


if __name__ == "__main__":
    key = jax.random.PRNGKey(0)
    batch, seq, embed_dim = 2, 8, 32   # hidden = 128

    kx, kp = jax.random.split(key)
    x = jax.random.normal(kx, (batch, seq, embed_dim), jnp.float32)
    w1, b1, w2, b2 = init_feed_forward_params(kp, embed_dim)

    # Pure-JAX reference (Linear -> ReLU -> Linear; Dropout(p=0) is identity).
    ref = jnp.maximum(x @ w1 + b1, 0.0) @ w2 + b2

    # Default fast path: bf16 matmuls with f32 accumulation (weights-resident here).
    out = jax.block_until_ready(feed_forward(x, w1, b1, w2, b2))
    assert out.shape == x.shape
    assert out.dtype == x.dtype
    assert jnp.allclose(out, ref, atol=3e-2, rtol=3e-2), "bf16 kernel mismatch vs reference"

    # Full-precision path for a tight numerical check.
    out_f32 = jax.block_until_ready(
        feed_forward(x, w1, b1, w2, b2, compute_dtype=jnp.float32))
    assert jnp.allclose(out_f32, ref, atol=1e-5, rtol=1e-5), "f32 kernel mismatch vs reference"

    # Exercise the H-tiled fallback path as well (force a tiny row tile so the
    # tile-selection / accumulator logic stays covered even at toy sizes).
    out_tiled = jax.block_until_ready(
        feed_forward(x, w1, b1, w2, b2, compute_dtype=jnp.float32, block_m=8))
    assert jnp.allclose(out_tiled, ref, atol=1e-5, rtol=1e-5), "tiled-path mismatch vs reference"

    print("KERNEL_OK")
</pallas_src>

<mosaic_0001>
module attributes {stable_mosaic.version = 11 : i64} {
  func.func @_ffn_kernel_resident(%arg0: i32, %arg1: memref<16x32xbf16, #tpu.memory_space<vmem>>, %arg2: memref<32x128xbf16, #tpu.memory_space<vmem>>, %arg3: memref<1x128xf32, #tpu.memory_space<vmem>>, %arg4: memref<128x32xbf16, #tpu.memory_space<vmem>>, %arg5: memref<1x32xf32, #tpu.memory_space<vmem>>, %arg6: memref<16x32xf32, #tpu.memory_space<vmem>>) attributes {dimension_semantics = [#tpu.dimension_semantics<parallel>], iteration_bounds = array<i64: 1>, scalar_prefetch = 0 : i64, scratch_operands = 0 : i64, tpu.core_type = #tpu.core_type<tc>, window_params = [{transform_indices = @transform_0, window_bounds = array<i64: 16, 32>}, {pipeline_mode = #tpu.pipeline_mode<synchronous>, transform_indices = @transform_1, window_bounds = array<i64: 32, 128>}, {pipeline_mode = #tpu.pipeline_mode<synchronous>, transform_indices = @transform_2, window_bounds = array<i64: 1, 128>}, {pipeline_mode = #tpu.pipeline_mode<synchronous>, transform_indices = @transform_3, window_bounds = array<i64: 128, 32>}, {pipeline_mode = #tpu.pipeline_mode<synchronous>, transform_indices = @transform_4, window_bounds = array<i64: 1, 32>}, {transform_indices = @transform_5, window_bounds = array<i64: 16, 32>}]} {
    %c0 = arith.constant 0 : index
    %c0_0 = arith.constant 0 : index
    %0 = vector.load %arg1[%c0, %c0_0] : memref<16x32xbf16, #tpu.memory_space<vmem>>, vector<16x32xbf16>
    %c0_1 = arith.constant 0 : index
    %c0_2 = arith.constant 0 : index
    %1 = vector.load %arg2[%c0_1, %c0_2] : memref<32x128xbf16, #tpu.memory_space<vmem>>, vector<32x128xbf16>
    %cst = arith.constant dense<0.000000e+00> : vector<16x128xf32>
    %2 = tpu.matmul %0, %1, %cst {dimension_numbers = #tpu.dot_dimension_numbers<[1], [0], [0], [1], [0, 0, 1, 1], [], []>} : vector<16x32xbf16>, vector<32x128xbf16>, vector<16x128xf32> -> vector<16x128xf32>
    %c0_3 = arith.constant 0 : index
    %c0_4 = arith.constant 0 : index
    %3 = vector.load %arg3[%c0_3, %c0_4] : memref<1x128xf32, #tpu.memory_space<vmem>>, vector<1x128xf32>
    %4 = vector.broadcast %3 : vector<1x128xf32> to vector<16x128xf32>
    %5 = arith.addf %2, %4 : vector<16x128xf32>
    %cst_5 = arith.constant 0.000000e+00 : f32
    %6 = vector.broadcast %cst_5 : f32 to vector<16x128xf32>
    %7 = arith.maximumf %5, %6 : vector<16x128xf32>
    %8 = arith.truncf %7 : vector<16x128xf32> to vector<16x128xbf16>
    %c0_6 = arith.constant 0 : index
    %c0_7 = arith.constant 0 : index
    %9 = vector.load %arg4[%c0_6, %c0_7] : memref<128x32xbf16, #tpu.memory_space<vmem>>, vector<128x32xbf16>
    %cst_8 = arith.constant dense<0.000000e+00> : vector<16x32xf32>
    %10 = tpu.matmul %8, %9, %cst_8 {dimension_numbers = #tpu.dot_dimension_numbers<[1], [0], [0], [1], [0, 0, 1, 1], [], []>} : vector<16x128xbf16>, vector<128x32xbf16>, vector<16x32xf32> -> vector<16x32xf32>
    %c0_9 = arith.constant 0 : index
    %c0_10 = arith.constant 0 : index
    %11 = vector.load %arg5[%c0_9, %c0_10] : memref<1x32xf32, #tpu.memory_space<vmem>>, vector<1x32xf32>
    %12 = vector.broadcast %11 : vector<1x32xf32> to vector<16x32xf32>
    %13 = arith.addf %10, %12 : vector<16x32xf32>
    %c0_11 = arith.constant 0 : index
    %c0_12 = arith.constant 0 : index
    %14 = vector.load %arg6[%c0_11, %c0_12] : memref<16x32xf32, #tpu.memory_space<vmem>>, vector<16x32xf32>
    tpu.vector_store %arg6[%c0_11, %c0_12], %13 {strides = array<i32>} : memref<16x32xf32, #tpu.memory_space<vmem>>, vector<16x32xf32>,
    return
  }
  func.func @transform_0(%arg0: i32) -> (i32, i32) {
    %c0_i32 = arith.constant 0 : i32
    %c0_i32_0 = arith.constant 0 : i32
    return %arg0, %c0_i32 : i32, i32
  }
  func.func @transform_1(%arg0: i32) -> (i32, i32) {
    %c0_i32 = arith.constant 0 : i32
    %c0_i32_0 = arith.constant 0 : i32
    %c0_i32_1 = arith.constant 0 : i32
    return %c0_i32, %c0_i32_0 : i32, i32
  }
  func.func @transform_2(%arg0: i32) -> (i32, i32) {
    %c0_i32 = arith.constant 0 : i32
    %c0_i32_0 = arith.constant 0 : i32
    %c0_i32_1 = arith.constant 0 : i32
    return %c0_i32, %c0_i32_0 : i32, i32
  }
  func.func @transform_3(%arg0: i32) -> (i32, i32) {
    %c0_i32 = arith.constant 0 : i32
    %c0_i32_0 = arith.constant 0 : i32
    %c0_i32_1 = arith.constant 0 : i32
    return %c0_i32, %c0_i32_0 : i32, i32
  }
  func.func @transform_4(%arg0: i32) -> (i32, i32) {
    %c0_i32 = arith.constant 0 : i32
    %c0_i32_0 = arith.constant 0 : i32
    %c0_i32_1 = arith.constant 0 : i32
    return %c0_i32, %c0_i32_0 : i32, i32
  }
  func.func @transform_5(%arg0: i32) -> (i32, i32) {
    %c0_i32 = arith.constant 0 : i32
    %c0_i32_0 = arith.constant 0 : i32
    return %arg0, %c0_i32 : i32, i32
  }
}

</mosaic_0001>

<bundles_post_ra>
// kernel: tpu_custom_call.1
= control target key start
LH: loop header
LB: loop body
LE: loop exit
PB: predicated region body
PF: predicated region fallthrough
CT: control target
= control target key end

     0   :  { %v324_v1 = vmov 0.0   ;;  %vm325_vm0 = vmmov 0   ;;  %vm52_vm1 = vcmask 261120   ;;  %s413_s0 = inlined_call_operand.vmem [shape: bf16[16,32], index: 0, kind: input, shape index: {}]   ;;  %s414_s1 = inlined_call_operand.vmem [shape: bf16[32,128], index: 1, kind: input, shape index: {}]   ;;  %s415_s2 = inlined_call_operand.vmem [shape: f32[1,128], index: 2, kind: input, shape index: {}]   ;;  %s416_s3 = inlined_call_operand.vmem [shape: bf16[128,32], index: 3, kind: input, shape index: {}]   ;;  %s417_s4 = inlined_call_operand.vmem [shape: f32[1,32], index: 4, kind: input, shape index: {}]   ;;  %s418_s5 = inlined_call_operand.hbm [shape: f32[16,32], index: 5, kind: output, shape index: {}]  }
   0x1   :  { %v289_v0 = vld [vmem:[%s414_s1] sm:$0xff]   ;;  %256 = vmatprep.subr.bf16.mxu0 %v324_v1  ;;  %264 = vmatprep.subr.bf16.mxu1 %v324_v1  ;;  %v290_v2 = vld [vmem:[%s414_s1 + $0x8] sm:$0xff]   ;;  %v294_v6 = vld [vmem:[%s416_s3 + $0x10] sm:$0xff]  }
   0x2   :  { %257 = vmatpush3.bf16.msra.mxu0 %v289_v0  ;;  %260 = vmatprep.mubr.msk.bf16.mxu0 %vm325_vm0, %v324_v1  ;;  %v292_v3 = vld [vmem:[%s416_s3] sm:$0xff]   ;;  %v293_v5 = vld [vmem:[%s416_s3 + $0x8] sm:$0xff]  }
   0x3   :  { %258 = vmatprep.subr.bf16.mxu0 %v324_v1  ;;  %280 = vmatprep.mubr.msk.bf16.mxu1 %vm325_vm0, %v324_v1  ;;  %v291_v4 = vld [vmem:[%s413_s0] sm:$0xff]  }
   0x4   :  { %265 = vmatpush3.bf16.msra.mxu1 %v292_v3 }
   0x5   :  { %266 = vmatprep.subr.bf16.mxu1 %v324_v1 }
   0x6   :  { %259 = vmatpush3.bf16.msra.mxu0 %v290_v2 }
   0x8   :  { %267 = vmatpush3.bf16.msra.mxu1 %v293_v5 }
   0x9   :  { %261 = vmatmul.mubr.msk.bf16.vlgmr.msra.gmra.mrb[0].mxu0 %vm52_vm1, %v291_v4  ;;  %268 = vmatprep.subr.bf16.mxu1 %v324_v1 }
   0xa   :  { %10 = vsyncpa [#allocation3], 0  ;;  %v295_v7 = vld [vmem:[%s416_s3 + $0x18] sm:$0xff]   ;;  %v296_v8 = vld [vmem:[%s416_s3 + $0x20] sm:$0xff]  }
   0xb   :  { %v297_v9 = vld [vmem:[%s416_s3 + $0x28] sm:$0xff]   ;;  %v298_v10 = vld [vmem:[%s416_s3 + $0x30] sm:$0xff]   ;;  %v299_v11 = vld [vmem:[%s416_s3 + $0x38] sm:$0xff]   ;;  %s326_s3 = smov [#allocation2]  }
   0xc   :  { %269 = vmatpush3.bf16.msra.mxu1 %v294_v6  ;;  %v230_v12 = vld [vmem:[%s415_s2] ss:$0 sm:$0xff]  ;;  %s219_s17 = sshll.u32 %s326_s3, 4  ;;  %s220_s17 = int_to_ptr.vmem [resolvable:$true] %s219_s17 }
   0xd   :  { %270 = vmatprep.subr.bf16.mxu1 %v324_v1  ;;  %v235_v22 = vld [vmem:[%s417_s4] ss:$0 sm:$0xff]  ;;  %s300_s2 = scalar_lea.vmem %s220_s17, 256  ;;  %p305_p1 = scmp.lt.s32.totalorder %s220_s17, %s220_s17 }
   0xe   :  { %p301_p0 = scmp.ne.s32.totalorder %s220_s17, %s300_s2  ;;  %p306_p2 = scmp.lt.s32.totalorder %s300_s2, %s300_s2 }
  0x10   :  { %271 = vmatpush3.bf16.msra.mxu1 %v295_v7  ;;  %p307_p3 = por %p306_p2, %p305_p1 }
  0x11   :  { %272 = vmatprep.subr.bf16.mxu1 %v324_v1 }
  0x12   :  { %p308_p4 = pnand %p307_p3, %p301_p0 }
  0x14   :  { %273 = vmatpush3.bf16.msra.mxu1 %v296_v8 }
  0x15   :  { %274 = vmatprep.subr.bf16.mxu1 %v324_v1 }
  0x18   :  { %275 = vmatpush3.bf16.msra.mxu1 %v297_v9 }
  0x19   :  { %276 = vmatprep.subr.bf16.mxu1 %v324_v1 }
  0x1c   :  { %277 = vmatpush3.bf16.msra.mxu1 %v298_v10 }
  0x1d   :  { %278 = vmatprep.subr.bf16.mxu1 %v324_v1 }
  0x20   :  { %279 = vmatpush3.bf16.msra.mxu1 %v299_v11 }
  0xdc   :  { %v90_v13 = vpop.f32.mrb[0].mxu0 }
  0xdd   :  { %v91_v14 = vadd.f32 %v230_v12, %v90_v13  ;;  %v262_v15 = vpop.f32.mrb[1].mxu0 }
  0xde   :  { %v93_v16 = vpop.f32.mrb[2].mxu0 }
  0xdf   :  { %v94_v17 = vadd.f32 %v230_v12, %v93_v16  ;;  %v263_v18 = vpop.f32.mrb[3].mxu0  ;;  %v97_v19 = vmax.f32 %v91_v14, 0.0 }
  0xe1   :  { %v98_v20 = vmax.f32 %v94_v17, 0.0 }
  0xe3   :  { %v99_v21 = vpack.c.bf16 %v98_v20, %v97_v19 }
  0xe5   :  { %281 = vmatmul.mubr.bf16.vlgmr.msra.gmra.mrb[0].mxu1 %v99_v21 }
 0x1b8   :  { %v205_v23 = vpop.f32.mrb[0].mxu1 }
 0x1b9   :  { %v206_v24 = vadd.f32 %v235_v22, %v205_v23  ;;  %v282_v25 = vpop.f32.mrb[1].mxu1 }
 0x1ba   :  { %v208_v26 = vpop.f32.mrb[2].mxu1 }
 0x1bb   :  { %212 = vst.msk [vmem:[#allocation2] sm:$0xff] %vm52_vm1, %v206_v24  ;;  %v209_v27 = vadd.f32 %v235_v22, %v208_v26  ;;  %v283_v28 = vpop.f32.mrb[3].mxu1 }
 0x1bd   :  { %213 = vst.msk [vmem:[#allocation2 + $0x8] sm:$0xff] %vm52_vm1, %v209_v27 }
 0x1be   :  { %311 = shalt.err (!%p308_p4)
}
 0x1bf   :  { %s312_s19 = scalar_lea.hbm %s418_s5, 256 }
 0x1c0   :  { %p313_p5 = scmp.ne.s32.totalorder %s418_s5, %s312_s19  ;;  %p316_p6 = scmp.lt.u32.totalorder %s312_s19, %s418_s5 }
 0x1c2   :  { %p318_p7 = pnand %p316_p6, %p313_p5 }
 0x1c4   :  { %321 = shalt.err (!%p318_p7)
}
 0x1c5   :  { %s327_s24 = smov 128   ;;  %s328_s25 = smov 8  }
 0x1c6   :  { %225 = dma.vmem_to_hbm [thread:$0]  %s220_s17, 256, %s418_s5, [#allocation3], %s327_s24, %s327_s24, %s328_s25  }
 0x1c7   :  { %322 = dma.done.wait [#allocation3], 256  }
 0x1c8   :  { %323 = vsyncadd [#allocation3], 4294967040 }
 0x1c9   :  { %229 = vsyncpa [#allocation3], 1 }

</bundles_post_ra>
